<compile_context>
chip_gen: v5e
topology: v5e:2x2
jax: 0.10.0
libtpu: 0.0.40
codegen_flags: <defaults>
</compile_context>

<pallas_src>
import jax
import jax.numpy as jnp
from jax import lax
from jax.experimental import pallas as pl
from jax.experimental.pallas import tpu as pltpu


def basic_block_kernel(x_ref, w1_ref, b1_ref, w2_ref, b2_ref, out_ref):
    """One batch block per grid step, merged (row, W*C) layout.

    x_ref:  (Bt, H, W*Cin)   input (also the identity shortcut)
    w1_ref: (3, W*Cin,  W*Cout)  banded conv1 weights (index 0 = dy tap), BN1 scale folded
    w2_ref: (3, W*Cout, W*Cout)  banded conv2 weights, BN2 scale folded
    b1_ref, b2_ref: (1, W*Cout)  folded BN biases, tiled over W (f32)
    out_ref: (Bt, H, W*Cout)
    """
    bt, H, wc_in = x_ref.shape
    wc_out = out_ref.shape[2]
    M = bt * H

    # (Bt, H, W*C) -> (Bt*H, W*C): merging leading dims is layout-free, and it folds
    # the batch into the matmul M dimension.
    x = x_ref[...].reshape(M, wc_in)

    # per-image border masks (rows are stacked images of height H)
    row = lax.broadcasted_iota(jnp.int32, (M, 1), 0)
    top = (row % H) == 0          # first row of each image
    bot = (row % H) == (H - 1)    # last row of each image

    def conv3x3(inp, w_ref):
        # One MXU matmul per kernel row dy. The banded weight already contains the
        # 3 kx taps and the zero padding in W, so K = W*C and N = W*Cout (lane dense).
        p0 = jnp.dot(inp, w_ref[0], preferred_element_type=jnp.float32)  # dy = 0 (row h-1)
        p1 = jnp.dot(inp, w_ref[1], preferred_element_type=jnp.float32)  # dy = 1 (row h)
        p2 = jnp.dot(inp, w_ref[2], preferred_element_type=jnp.float32)  # dy = 2 (row h+1)
        # output row h collects p0[h-1] + p1[h] + p2[h+1]; zero at image borders
        dn = jnp.where(top, 0.0, jnp.concatenate([p0[:1], p0[:-1]], axis=0))
        up = jnp.where(bot, 0.0, jnp.concatenate([p2[1:], p2[-1:]], axis=0))
        return p1 + dn + up

    # conv1 + (folded) bn1 + relu  -- f32 epilogue
    y1 = jnp.maximum(conv3x3(x, w1_ref) + b1_ref[...], 0.0)
    # conv2 + (folded) bn2
    y2 = conv3x3(y1.astype(x.dtype), w2_ref) + b2_ref[...]
    # identity shortcut + final relu
    out = jnp.maximum(y2 + x.astype(jnp.float32), 0.0)
    out_ref[...] = out.reshape(bt, H, wc_out).astype(out_ref.dtype)


def basic_block_forward(x_nchw, params, eps=1e-5, matmul_dtype=None, batch_block=None):
    """matmul_dtype: set to jnp.bfloat16 on v6e/v7x for 2x MXU rate (f32 epilogue kept)."""
    B, Cin, H, W = x_nchw.shape
    Cout = params['w1'].shape[0]
    assert Cin == Cout, "identity shortcut requires in_planes == planes (stride=1)"
    # TODO(synk): stride!=1 / 1x1-conv shortcut and CBAM are not handled in the kernel.

    f32 = jnp.float32
    # fold BN (inference mode, running stats) into per-out-channel scale/bias
    s1 = params['bn1_gamma'] / jnp.sqrt(params['bn1_var'] + eps)
    b1 = params['bn1_beta'] - params['bn1_mean'] * s1
    s2 = params['bn2_gamma'] / jnp.sqrt(params['bn2_var'] + eps)
    b2 = params['bn2_beta'] - params['bn2_mean'] * s2

    # torch conv weight (Cout, Cin, kh, kw) -> (kh, kw, Cin, Cout), BN scale folded in
    w1_t = jnp.transpose(params['w1'], (2, 3, 1, 0)) * s1
    w2_t = jnp.transpose(params['w2'], (2, 3, 1, 0)) * s2

    def banded(w_t):
        # Build (3, W*Cin, W*Cout): for each dy, a block-banded matrix that applies the
        # three kx taps (with zero padding in W) to a merged (W*Cin) row.
        kh, kw, ci, co = w_t.shape
        wi = jnp.arange(W)[None, :, None]          # input column
        wo = jnp.arange(W)[None, None, :]          # output column
        dx = jnp.arange(kw)[:, None, None]
        sel = (wi == wo + dx - 1).astype(w_t.dtype)          # (3, W, W)
        wb = jnp.einsum('xiw,yxco->yicwo', sel, w_t)          # (3, W, Cin, W, Cout)
        return wb.reshape(kh, W * ci, W * co)

    wb1 = banded(w1_t).astype(f32)
    wb2 = banded(w2_t).astype(f32)

    # lane-dense merged layout: NCHW -> NHWC -> (B, H, W*C)
    x_m = jnp.transpose(x_nchw, (0, 2, 3, 1)).reshape(B, H, W * Cin)
    b1_m = jnp.tile(b1, W).reshape(1, W * Cout).astype(f32)
    b2_m = jnp.tile(b2, W).reshape(1, W * Cout).astype(f32)

    if matmul_dtype is not None:
        x_m = x_m.astype(matmul_dtype)
        wb1 = wb1.astype(matmul_dtype)
        wb2 = wb2.astype(matmul_dtype)

    # block several batch elements per grid step (whole batch for small problems)
    if batch_block is None:
        batch_block = max(1, min(B, 512 // max(H, 1)))
    while B % batch_block:
        batch_block -= 1
    grid = (B // batch_block,)

    out_m = pl.pallas_call(
        basic_block_kernel,
        out_shape=jax.ShapeDtypeStruct((B, H, W * Cout), x_nchw.dtype),
        grid_spec=pltpu.PrefetchScalarGridSpec(
            num_scalar_prefetch=0,
            grid=grid,
            in_specs=[
                pl.BlockSpec((batch_block, H, W * Cin), lambda i: (i, 0, 0)),
                pl.BlockSpec((3, W * Cin, W * Cout), lambda i: (0, 0, 0)),
                pl.BlockSpec((1, W * Cout), lambda i: (0, 0)),
                pl.BlockSpec((3, W * Cout, W * Cout), lambda i: (0, 0, 0)),
                pl.BlockSpec((1, W * Cout), lambda i: (0, 0)),
            ],
            out_specs=pl.BlockSpec((batch_block, H, W * Cout), lambda i: (i, 0, 0)),
        ),
        compiler_params=pltpu.CompilerParams(
            dimension_semantics=("parallel",),
            vmem_limit_bytes=32 * 1024 * 1024,
        ),
    )(x_m, wb1, b1_m, wb2, b2_m)

    # (B, H, W*Cout) -> NCHW
    return jnp.transpose(out_m.reshape(B, H, W, Cout), (0, 3, 1, 2))


def reference_forward(x, params, eps=1e-5):
    """Pure-JAX reference in NCHW (mirrors the PyTorch forward, inference BN)."""
    def conv(x, w):
        return lax.conv_general_dilated(
            x, w, window_strides=(1, 1), padding=((1, 1), (1, 1)),
            dimension_numbers=('NCHW', 'OIHW', 'NCHW'))

    def bn(x, g, b, m, v):
        g, b, m, v = (t[None, :, None, None] for t in (g, b, m, v))
        return (x - m) / jnp.sqrt(v + eps) * g + b

    out = jax.nn.relu(bn(conv(x, params['w1']), params['bn1_gamma'],
                         params['bn1_beta'], params['bn1_mean'], params['bn1_var']))
    out = bn(conv(out, params['w2']), params['bn2_gamma'],
             params['bn2_beta'], params['bn2_mean'], params['bn2_var'])
    out = out + x  # identity shortcut
    return jax.nn.relu(out)


if __name__ == "__main__":
    B, C, H, W = 2, 8, 16, 16   # in_planes = planes = 8, stride = 1 (W*C = 128 lanes)
    keys = jax.random.split(jax.random.PRNGKey(0), 12)
    x = jax.random.normal(keys[0], (B, C, H, W), jnp.float32)

    params = {
        'w1': jax.random.normal(keys[1], (C, C, 3, 3), jnp.float32) * 0.1,
        'w2': jax.random.normal(keys[2], (C, C, 3, 3), jnp.float32) * 0.1,
        'bn1_gamma': 1.0 + 0.1 * jax.random.normal(keys[3], (C,), jnp.float32),
        'bn1_beta': 0.1 * jax.random.normal(keys[4], (C,), jnp.float32),
        'bn1_mean': 0.1 * jax.random.normal(keys[5], (C,), jnp.float32),
        'bn1_var': jax.nn.softplus(jax.random.normal(keys[6], (C,), jnp.float32)) + 0.5,
        'bn2_gamma': 1.0 + 0.1 * jax.random.normal(keys[7], (C,), jnp.float32),
        'bn2_beta': 0.1 * jax.random.normal(keys[8], (C,), jnp.float32),
        'bn2_mean': 0.1 * jax.random.normal(keys[9], (C,), jnp.float32),
        'bn2_var': jax.nn.softplus(jax.random.normal(keys[10], (C,), jnp.float32)) + 0.5,
    }

    out = basic_block_forward(x, params)
    out = jax.block_until_ready(out)

    ref = reference_forward(x, params)
    assert out.shape == (B, C, H, W)
    err = jnp.max(jnp.abs(out - ref))
    assert jnp.allclose(out, ref, atol=2e-4, rtol=2e-4), f"max err {err}"
    print("KERNEL_OK")
</pallas_src>

<mosaic_0001>
module attributes {stable_mosaic.version = 11 : i64} {
  func.func @basic_block_kernel(%arg0: i32, %arg1: memref<2x16x128xf32, #tpu.memory_space<vmem>>, %arg2: memref<3x128x128xf32, #tpu.memory_space<vmem>>, %arg3: memref<1x128xf32, #tpu.memory_space<vmem>>, %arg4: memref<3x128x128xf32, #tpu.memory_space<vmem>>, %arg5: memref<1x128xf32, #tpu.memory_space<vmem>>, %arg6: memref<2x16x128xf32, #tpu.memory_space<vmem>>) attributes {dimension_semantics = [#tpu.dimension_semantics<parallel>], iteration_bounds = array<i64: 1>, scalar_prefetch = 0 : i64, scratch_operands = 0 : i64, tpu.core_type = #tpu.core_type<tc>, window_params = [{transform_indices = @transform_0, window_bounds = array<i64: 2, 16, 128>}, {pipeline_mode = #tpu.pipeline_mode<synchronous>, transform_indices = @transform_1, window_bounds = array<i64: 3, 128, 128>}, {pipeline_mode = #tpu.pipeline_mode<synchronous>, transform_indices = @transform_2, window_bounds = array<i64: 1, 128>}, {pipeline_mode = #tpu.pipeline_mode<synchronous>, transform_indices = @transform_3, window_bounds = array<i64: 3, 128, 128>}, {pipeline_mode = #tpu.pipeline_mode<synchronous>, transform_indices = @transform_4, window_bounds = array<i64: 1, 128>}, {transform_indices = @transform_5, window_bounds = array<i64: 2, 16, 128>}]} {
    %c0 = arith.constant 0 : index
    %c0_0 = arith.constant 0 : index
    %c0_1 = arith.constant 0 : index
    %0 = vector.load %arg1[%c0, %c0_0, %c0_1] : memref<2x16x128xf32, #tpu.memory_space<vmem>>, vector<2x16x128xf32>
    %1 = vector.shape_cast %0 : vector<2x16x128xf32> to vector<32x128xf32>
    %2 = tpu.iota {dimensions = array<i32: 0>} : vector<32x1xi32>
    %c16_i32 = arith.constant 16 : i32
    %c0_i32 = arith.constant 0 : i32
    %3 = arith.cmpi eq, %c16_i32, %c0_i32 : i32
    %c1_i32 = arith.constant 1 : i32
    %4 = arith.select %3, %c1_i32, %c16_i32 : i32
    %5 = vector.broadcast %4 : i32 to vector<32x1xi32>
    %6 = arith.remsi %2, %5 : vector<32x1xi32>
    %c0_i32_2 = arith.constant 0 : i32
    %7 = vector.broadcast %c0_i32_2 : i32 to vector<32x1xi32>
    %8 = arith.cmpi ne, %6, %7 : vector<32x1xi32>
    %c0_i32_3 = arith.constant 0 : i32
    %9 = vector.broadcast %c0_i32_3 : i32 to vector<32x1xi32>
    %10 = arith.cmpi slt, %6, %9 : vector<32x1xi32>
    %c0_i32_4 = arith.constant 0 : i32
    %11 = arith.cmpi slt, %4, %c0_i32_4 : i32
    %12 = vector.broadcast %11 : i1 to vector<32x1xi1>
    %13 = vector.broadcast %12 : vector<32x1xi1> to vector<32x1xi1>
    %14 = arith.xori %10, %13 : vector<32x1xi1>
    %15 = arith.andi %14, %8 : vector<32x1xi1>
    %16 = vector.broadcast %4 : i32 to vector<32x1xi32>
    %17 = arith.addi %6, %16 : vector<32x1xi32>
    %18 = arith.select %15, %17, %6 : vector<32x1xi1>, vector<32x1xi32>
    %c0_i32_5 = arith.constant 0 : i32
    %19 = vector.broadcast %c0_i32_5 : i32 to vector<32x1xi32>
    %20 = arith.cmpi eq, %18, %19 : vector<32x1xi32>
    %c16_i32_6 = arith.constant 16 : i32
    %c0_i32_7 = arith.constant 0 : i32
    %21 = arith.cmpi eq, %c16_i32_6, %c0_i32_7 : i32
    %c1_i32_8 = arith.constant 1 : i32
    %22 = arith.select %21, %c1_i32_8, %c16_i32_6 : i32
    %23 = vector.broadcast %22 : i32 to vector<32x1xi32>
    %24 = arith.remsi %2, %23 : vector<32x1xi32>
    %c0_i32_9 = arith.constant 0 : i32
    %25 = vector.broadcast %c0_i32_9 : i32 to vector<32x1xi32>
    %26 = arith.cmpi ne, %24, %25 : vector<32x1xi32>
    %c0_i32_10 = arith.constant 0 : i32
    %27 = vector.broadcast %c0_i32_10 : i32 to vector<32x1xi32>
    %28 = arith.cmpi slt, %24, %27 : vector<32x1xi32>
    %c0_i32_11 = arith.constant 0 : i32
    %29 = arith.cmpi slt, %22, %c0_i32_11 : i32
    %30 = vector.broadcast %29 : i1 to vector<32x1xi1>
    %31 = vector.broadcast %30 : vector<32x1xi1> to vector<32x1xi1>
    %32 = arith.xori %28, %31 : vector<32x1xi1>
    %33 = arith.andi %32, %26 : vector<32x1xi1>
    %34 = vector.broadcast %22 : i32 to vector<32x1xi32>
    %35 = arith.addi %24, %34 : vector<32x1xi32>
    %36 = arith.select %33, %35, %24 : vector<32x1xi1>, vector<32x1xi32>
    %c15_i32 = arith.constant 15 : i32
    %37 = vector.broadcast %c15_i32 : i32 to vector<32x1xi32>
    %38 = arith.cmpi eq, %36, %37 : vector<32x1xi32>
    %c0_12 = arith.constant 0 : index
    %c0_13 = arith.constant 0 : index
    %c0_14 = arith.constant 0 : index
    %39 = vector.load %arg2[%c0_12, %c0_13, %c0_14] : memref<3x128x128xf32, #tpu.memory_space<vmem>>, vector<1x128x128xf32>
    %40 = vector.shape_cast %39 : vector<1x128x128xf32> to vector<128x128xf32>
    %cst = arith.constant dense<0.000000e+00> : vector<32x128xf32>
    %41 = tpu.matmul %1, %40, %cst {dimension_numbers = #tpu.dot_dimension_numbers<[1], [0], [0], [1], [0, 0, 1, 1], [], []>} : vector<32x128xf32>, vector<128x128xf32>, vector<32x128xf32> -> vector<32x128xf32>
    %c1 = arith.constant 1 : index
    %c0_15 = arith.constant 0 : index
    %c0_16 = arith.constant 0 : index
    %42 = vector.load %arg2[%c1, %c0_15, %c0_16] : memref<3x128x128xf32, #tpu.memory_space<vmem>>, vector<1x128x128xf32>
    %43 = vector.shape_cast %42 : vector<1x128x128xf32> to vector<128x128xf32>
    %cst_17 = arith.constant dense<0.000000e+00> : vector<32x128xf32>
    %44 = tpu.matmul %1, %43, %cst_17 {dimension_numbers = #tpu.dot_dimension_numbers<[1], [0], [0], [1], [0, 0, 1, 1], [], []>} : vector<32x128xf32>, vector<128x128xf32>, vector<32x128xf32> -> vector<32x128xf32>
    %c2 = arith.constant 2 : index
    %c0_18 = arith.constant 0 : index
    %c0_19 = arith.constant 0 : index
    %45 = vector.load %arg2[%c2, %c0_18, %c0_19] : memref<3x128x128xf32, #tpu.memory_space<vmem>>, vector<1x128x128xf32>
    %46 = vector.shape_cast %45 : vector<1x128x128xf32> to vector<128x128xf32>
    %cst_20 = arith.constant dense<0.000000e+00> : vector<32x128xf32>
    %47 = tpu.matmul %1, %46, %cst_20 {dimension_numbers = #tpu.dot_dimension_numbers<[1], [0], [0], [1], [0, 0, 1, 1], [], []>} : vector<32x128xf32>, vector<128x128xf32>, vector<32x128xf32> -> vector<32x128xf32>
    %48 = vector.extract_strided_slice %41 {offsets = [0, 0], sizes = [1, 128], strides = [1, 1]} : vector<32x128xf32> to vector<1x128xf32>
    %49 = vector.extract_strided_slice %41 {offsets = [0, 0], sizes = [31, 128], strides = [1, 1]} : vector<32x128xf32> to vector<31x128xf32>
    %50 = tpu.concatenate %48, %49 in 0 : vector<1x128xf32>, vector<31x128xf32> -> vector<32x128xf32>
    %cst_21 = arith.constant 0.000000e+00 : f32
    %51 = vector.shape_cast %20 : vector<32x1xi1> to vector<32x1xi1>
    %52 = vector.broadcast %51 : vector<32x1xi1> to vector<32x128xi1>
    %53 = vector.broadcast %cst_21 : f32 to vector<32x128xf32>
    %54 = arith.select %52, %53, %50 : vector<32x128xi1>, vector<32x128xf32>
    %55 = vector.extract_strided_slice %47 {offsets = [1, 0], sizes = [31, 128], strides = [1, 1]} : vector<32x128xf32> to vector<31x128xf32>
    %56 = vector.extract_strided_slice %47 {offsets = [31, 0], sizes = [1, 128], strides = [1, 1]} : vector<32x128xf32> to vector<1x128xf32>
    %57 = tpu.concatenate %55, %56 in 0 : vector<31x128xf32>, vector<1x128xf32> -> vector<32x128xf32>
    %cst_22 = arith.constant 0.000000e+00 : f32
    %58 = vector.shape_cast %38 : vector<32x1xi1> to vector<32x1xi1>
    %59 = vector.broadcast %58 : vector<32x1xi1> to vector<32x128xi1>
    %60 = vector.broadcast %cst_22 : f32 to vector<32x128xf32>
    %61 = arith.select %59, %60, %57 : vector<32x128xi1>, vector<32x128xf32>
    %62 = arith.addf %44, %54 : vector<32x128xf32>
    %63 = arith.addf %62, %61 : vector<32x128xf32>
    %c0_23 = arith.constant 0 : index
    %c0_24 = arith.constant 0 : index
    %64 = vector.load %arg3[%c0_23, %c0_24] : memref<1x128xf32, #tpu.memory_space<vmem>>, vector<1x128xf32>
    %65 = vector.broadcast %64 : vector<1x128xf32> to vector<32x128xf32>
    %66 = arith.addf %63, %65 : vector<32x128xf32>
    %cst_25 = arith.constant 0.000000e+00 : f32
    %67 = vector.broadcast %cst_25 : f32 to vector<32x128xf32>
    %68 = arith.maximumf %66, %67 : vector<32x128xf32>
    %c0_26 = arith.constant 0 : index
    %c0_27 = arith.constant 0 : index
    %c0_28 = arith.constant 0 : index
    %69 = vector.load %arg4[%c0_26, %c0_27, %c0_28] : memref<3x128x128xf32, #tpu.memory_space<vmem>>, vector<1x128x128xf32>
    %70 = vector.shape_cast %69 : vector<1x128x128xf32> to vector<128x128xf32>
    %cst_29 = arith.constant dense<0.000000e+00> : vector<32x128xf32>
    %71 = tpu.matmul %68, %70, %cst_29 {dimension_numbers = #tpu.dot_dimension_numbers<[1], [0], [0], [1], [0, 0, 1, 1], [], []>} : vector<32x128xf32>, vector<128x128xf32>, vector<32x128xf32> -> vector<32x128xf32>
    %c1_30 = arith.constant 1 : index
    %c0_31 = arith.constant 0 : index
    %c0_32 = arith.constant 0 : index
    %72 = vector.load %arg4[%c1_30, %c0_31, %c0_32] : memref<3x128x128xf32, #tpu.memory_space<vmem>>, vector<1x128x128xf32>
    %73 = vector.shape_cast %72 : vector<1x128x128xf32> to vector<128x128xf32>
    %cst_33 = arith.constant dense<0.000000e+00> : vector<32x128xf32>
    %74 = tpu.matmul %68, %73, %cst_33 {dimension_numbers = #tpu.dot_dimension_numbers<[1], [0], [0], [1], [0, 0, 1, 1], [], []>} : vector<32x128xf32>, vector<128x128xf32>, vector<32x128xf32> -> vector<32x128xf32>
    %c2_34 = arith.constant 2 : index
    %c0_35 = arith.constant 0 : index
    %c0_36 = arith.constant 0 : index
    %75 = vector.load %arg4[%c2_34, %c0_35, %c0_36] : memref<3x128x128xf32, #tpu.memory_space<vmem>>, vector<1x128x128xf32>
    %76 = vector.shape_cast %75 : vector<1x128x128xf32> to vector<128x128xf32>
    %cst_37 = arith.constant dense<0.000000e+00> : vector<32x128xf32>
    %77 = tpu.matmul %68, %76, %cst_37 {dimension_numbers = #tpu.dot_dimension_numbers<[1], [0], [0], [1], [0, 0, 1, 1], [], []>} : vector<32x128xf32>, vector<128x128xf32>, vector<32x128xf32> -> vector<32x128xf32>
    %78 = vector.extract_strided_slice %71 {offsets = [0, 0], sizes = [1, 128], strides = [1, 1]} : vector<32x128xf32> to vector<1x128xf32>
    %79 = vector.extract_strided_slice %71 {offsets = [0, 0], sizes = [31, 128], strides = [1, 1]} : vector<32x128xf32> to vector<31x128xf32>
    %80 = tpu.concatenate %78, %79 in 0 : vector<1x128xf32>, vector<31x128xf32> -> vector<32x128xf32>
    %cst_38 = arith.constant 0.000000e+00 : f32
    %81 = vector.shape_cast %20 : vector<32x1xi1> to vector<32x1xi1>
    %82 = vector.broadcast %81 : vector<32x1xi1> to vector<32x128xi1>
    %83 = vector.broadcast %cst_38 : f32 to vector<32x128xf32>
    %84 = arith.select %82, %83, %80 : vector<32x128xi1>, vector<32x128xf32>
    %85 = vector.extract_strided_slice %77 {offsets = [1, 0], sizes = [31, 128], strides = [1, 1]} : vector<32x128xf32> to vector<31x128xf32>
    %86 = vector.extract_strided_slice %77 {offsets = [31, 0], sizes = [1, 128], strides = [1, 1]} : vector<32x128xf32> to vector<1x128xf32>
    %87 = tpu.concatenate %85, %86 in 0 : vector<31x128xf32>, vector<1x128xf32> -> vector<32x128xf32>
    %cst_39 = arith.constant 0.000000e+00 : f32
    %88 = vector.shape_cast %38 : vector<32x1xi1> to vector<32x1xi1>
    %89 = vector.broadcast %88 : vector<32x1xi1> to vector<32x128xi1>
    %90 = vector.broadcast %cst_39 : f32 to vector<32x128xf32>
    %91 = arith.select %89, %90, %87 : vector<32x128xi1>, vector<32x128xf32>
    %92 = arith.addf %74, %84 : vector<32x128xf32>
    %93 = arith.addf %92, %91 : vector<32x128xf32>
    %c0_40 = arith.constant 0 : index
    %c0_41 = arith.constant 0 : index
    %94 = vector.load %arg5[%c0_40, %c0_41] : memref<1x128xf32, #tpu.memory_space<vmem>>, vector<1x128xf32>
    %95 = vector.broadcast %94 : vector<1x128xf32> to vector<32x128xf32>
    %96 = arith.addf %93, %95 : vector<32x128xf32>
    %97 = arith.addf %96, %1 : vector<32x128xf32>
    %cst_42 = arith.constant 0.000000e+00 : f32
    %98 = vector.broadcast %cst_42 : f32 to vector<32x128xf32>
    %99 = arith.maximumf %97, %98 : vector<32x128xf32>
    %100 = vector.shape_cast %99 : vector<32x128xf32> to vector<2x16x128xf32>
    %c0_43 = arith.constant 0 : index
    %c0_44 = arith.constant 0 : index
    %c0_45 = arith.constant 0 : index
    %101 = vector.load %arg6[%c0_43, %c0_44, %c0_45] : memref<2x16x128xf32, #tpu.memory_space<vmem>>, vector<2x16x128xf32>
    tpu.vector_store %arg6[%c0_43, %c0_44, %c0_45], %100 {strides = array<i32>} : memref<2x16x128xf32, #tpu.memory_space<vmem>>, vector<2x16x128xf32>,
    return
  }
  func.func @transform_0(%arg0: i32) -> (i32, i32, i32) {
    %c0_i32 = arith.constant 0 : i32
    %c0_i32_0 = arith.constant 0 : i32
    %c0_i32_1 = arith.constant 0 : i32
    return %arg0, %c0_i32, %c0_i32_0 : i32, i32, i32
  }
  func.func @transform_1(%arg0: i32) -> (i32, i32, i32) {
    %c0_i32 = arith.constant 0 : i32
    %c0_i32_0 = arith.constant 0 : i32
    %c0_i32_1 = arith.constant 0 : i32
    %c0_i32_2 = arith.constant 0 : i32
    return %c0_i32, %c0_i32_0, %c0_i32_1 : i32, i32, i32
  }
  func.func @transform_2(%arg0: i32) -> (i32, i32) {
    %c0_i32 = arith.constant 0 : i32
    %c0_i32_0 = arith.constant 0 : i32
    %c0_i32_1 = arith.constant 0 : i32
    return %c0_i32, %c0_i32_0 : i32, i32
  }
  func.func @transform_3(%arg0: i32) -> (i32, i32, i32) {
    %c0_i32 = arith.constant 0 : i32
    %c0_i32_0 = arith.constant 0 : i32
    %c0_i32_1 = arith.constant 0 : i32
    %c0_i32_2 = arith.constant 0 : i32
    return %c0_i32, %c0_i32_0, %c0_i32_1 : i32, i32, i32
  }
  func.func @transform_4(%arg0: i32) -> (i32, i32) {
    %c0_i32 = arith.constant 0 : i32
    %c0_i32_0 = arith.constant 0 : i32
    %c0_i32_1 = arith.constant 0 : i32
    return %c0_i32, %c0_i32_0 : i32, i32
  }
  func.func @transform_5(%arg0: i32) -> (i32, i32, i32) {
    %c0_i32 = arith.constant 0 : i32
    %c0_i32_0 = arith.constant 0 : i32
    %c0_i32_1 = arith.constant 0 : i32
    return %arg0, %c0_i32, %c0_i32_0 : i32, i32, i32
  }
}

</mosaic_0001>

<bundles_post_ra>
// kernel: tpu_custom_call.1
= control target key start
LH: loop header
LB: loop body
LE: loop exit
PB: predicated region body
PF: predicated region fallthrough
CT: control target
= control target key end

     0   :  { %10 = vsyncpa [#allocation3], 0  ;;  %s885_s0 = inlined_call_operand.hbm [shape: f32[2,16,128], index: 0, kind: input, shape index: {}]   ;;  %s886_s1 = inlined_call_operand.hbm [shape: f32[3,128,128], index: 1, kind: input, shape index: {}]   ;;  %s887_s2 = inlined_call_operand.vmem [shape: f32[1,128], index: 2, kind: input, shape index: {}]   ;;  %s888_s3 = inlined_call_operand.hbm [shape: f32[3,128,128], index: 3, kind: input, shape index: {}]   ;;  %s889_s4 = inlined_call_operand.vmem [shape: f32[1,128], index: 4, kind: input, shape index: {}]   ;;  %s890_s5 = inlined_call_operand.hbm [shape: f32[2,16,128], index: 5, kind: output, shape index: {}]  }
   0x1   :  { %11 = vsyncpa [#allocation6], 0 }
   0x2   :  { %12 = vsyncpa [#allocation4], 0  ;;  %s30_s20 = sshll.u32 %s886_s1, 4  ;;  %s707_s21 = smov [#allocation5]   ;;  %s31_s20 = int_to_ptr.hbm [resolvable:$true] %s30_s20 }
   0x3   :  { %s32_s22 = sshll.u32 %s707_s21, 4  ;;  %s17_s25 = sshll.u32 %s885_s0, 4  ;;  %s33_s22 = int_to_ptr.vmem [resolvable:$true] %s32_s22  ;;  %s18_s25 = int_to_ptr.hbm [resolvable:$true] %s17_s25 }
   0x4   :  { %s708_s26 = smov 128   ;;  %s709_s27 = smov 8  }
   0x5   :  { %38 = dma.hbm_to_vmem [thread:$0]  %s31_s20, 6144, %s33_s22, [#allocation6], %s708_s26, %s708_s26, %s709_s27  }
   0x6   :  { %s710_s28 = smov [#allocation2]   ;;  %s45_s1 = sshll.u32 %s888_s3, 4  ;;  %s46_s1 = int_to_ptr.hbm [resolvable:$true] %s45_s1 }
   0x7   :  { %s19_s29 = sshll.u32 %s710_s28, 4  ;;  %s711_s0 = smov [#allocation7]   ;;  %s20_s29 = int_to_ptr.vmem [resolvable:$true] %s19_s29 }
   0x8   :  { %25 = dma.hbm_to_vmem [thread:$0]  %s18_s25, 512, %s20_s29, [#allocation3], %s708_s26, %s708_s26, %s709_s27  }
   0x9   :  { %s47_s7 = sshll.u32 %s711_s0, 4  ;;  %s48_s7 = int_to_ptr.vmem [resolvable:$true] %s47_s7 }
   0xa   :  { %53 = dma.hbm_to_vmem [thread:$0]  %s46_s1, 6144, %s48_s7, [#allocation6], %s708_s26, %s708_s26, %s709_s27  }
   0xb   :  { %701 = dma.done.wait [#allocation3], 512  }
   0xc   :  { %702 = vsyncadd [#allocation3], 4294966784 }
   0xd   :  { %703 = dma.done.wait [#allocation6], 12288  }
   0xe   :  { %704 = vsyncadd [#allocation6], 4294955008  ;;  %v148_v0 = vld [vmem:[#allocation5 + $0x78] sm:$0xff]  ;;  %v147_v3 = vld [vmem:[#allocation5 + $0x70] sm:$0xff]  ;;  %vm245_vm0 = vcmask 1040384   ;;  %vm274_vm2 = vcmask 1046528  }
   0xf   :  { %v211_v1 = vld [vmem:[#allocation5 + $0x178] sm:$0xff]  ;;  %149 = vmatpush.msra.mxu0 %v148_v0  ;;  %v210_v4 = vld [vmem:[#allocation5 + $0x170] sm:$0xff]  ;;  %v146_v6 = vld [vmem:[#allocation5 + $0x68] sm:$0xff]  ;;  %s551_s13 = sshll.u32 %s890_s5, 4  ;;  %s552_s13 = int_to_ptr.hbm [resolvable:$true] %s551_s13 }
  0x10   :  { %v194_v2 = vld [vmem:[#allocation5 + $0xf8] sm:$0xff]  ;;  %212 = vmatpush.msra.mxu1 %v211_v1  ;;  %v193_v5 = vld [vmem:[#allocation5 + $0xf0] sm:$0xff]  ;;  %v209_v7 = vld [vmem:[#allocation5 + $0x168] sm:$0xff] }
  0x11   :  { %299 = vmatpush.msra.mxu2 %v194_v2  ;;  %150 = vmatpush.msra.mxu0 %v147_v3  ;;  %v192_v8 = vld [vmem:[#allocation5 + $0xe8] sm:$0xff]  ;;  %v145_v9 = vld [vmem:[#allocation5 + $0x60] sm:$0xff]  ;;  %v144_v12 = vld [vmem:[#allocation5 + $0x58] sm:$0xff] }
  0x12   :  { %213 = vmatpush.msra.mxu1 %v210_v4  ;;  %v208_v10 = vld [vmem:[#allocation5 + $0x160] sm:$0xff]  ;;  %v207_v13 = vld [vmem:[#allocation5 + $0x158] sm:$0xff]  ;;  %v143_v15 = vld [vmem:[#allocation5 + $0x50] sm:$0xff] }
  0x13   :  { %300 = vmatpush.msra.mxu2 %v193_v5  ;;  %151 = vmatpush.msra.mxu0 %v146_v6  ;;  %v191_v11 = vld [vmem:[#allocation5 + $0xe0] sm:$0xff]  ;;  %v190_v14 = vld [vmem:[#allocation5 + $0xd8] sm:$0xff]  ;;  %v206_v16 = vld [vmem:[#allocation5 + $0x150] sm:$0xff] }
  0x14   :  { %214 = vmatpush.msra.mxu1 %v209_v7  ;;  %v189_v17 = vld [vmem:[#allocation5 + $0xd0] sm:$0xff]  ;;  %v142_v18 = vld [vmem:[#allocation5 + $0x48] sm:$0xff]  ;;  %v141_v21 = vld [vmem:[#allocation5 + $0x40] sm:$0xff] }
  0x15   :  { %301 = vmatpush.msra.mxu2 %v192_v8  ;;  %152 = vmatpush.msra.mxu0 %v145_v9  ;;  %v205_v19 = vld [vmem:[#allocation5 + $0x148] sm:$0xff]  ;;  %v204_v22 = vld [vmem:[#allocation5 + $0x140] sm:$0xff]  ;;  %v140_v24 = vld [vmem:[#allocation5 + $0x38] sm:$0xff] }
  0x16   :  { %215 = vmatpush.msra.mxu1 %v208_v10  ;;  %v188_v20 = vld [vmem:[#allocation5 + $0xc8] sm:$0xff]  ;;  %v187_v23 = vld [vmem:[#allocation5 + $0xc0] sm:$0xff]  ;;  %v203_v25 = vld [vmem:[#allocation5 + $0x138] sm:$0xff] }
  0x17   :  { %302 = vmatpush.msra.mxu2 %v191_v11  ;;  %153 = vmatpush.msra.mxu0 %v144_v12  ;;  %v186_v26 = vld [vmem:[#allocation5 + $0xb8] sm:$0xff]  ;;  %v139_v27 = vld [vmem:[#allocation5 + $0x30] sm:$0xff]  ;;  %v138_v30 = vld [vmem:[#allocation5 + $0x28] sm:$0xff] }
  0x18   :  { %216 = vmatpush.msra.mxu1 %v207_v13  ;;  %v202_v28 = vld [vmem:[#allocation5 + $0x130] sm:$0xff]  ;;  %v201_v31 = vld [vmem:[#allocation5 + $0x128] sm:$0xff]  ;;  %v137_v33 = vld [vmem:[#allocation5 + $0x20] sm:$0xff] }
  0x19   :  { %303 = vmatpush.msra.mxu2 %v190_v14  ;;  %154 = vmatpush.msra.mxu0 %v143_v15  ;;  %v185_v29 = vld [vmem:[#allocation5 + $0xb0] sm:$0xff]  ;;  %v184_v32 = vld [vmem:[#allocation5 + $0xa8] sm:$0xff]  ;;  %v200_v34 = vld [vmem:[#allocation5 + $0x120] sm:$0xff] }
  0x1a   :  { %217 = vmatpush.msra.mxu1 %v206_v16  ;;  %v183_v35 = vld [vmem:[#allocation5 + $0xa0] sm:$0xff]  ;;  %v136_v36 = vld [vmem:[#allocation5 + $0x18] sm:$0xff]  ;;  %v135_v39 = vld [vmem:[#allocation5 + $0x10] sm:$0xff] }
  0x1b   :  { %304 = vmatpush.msra.mxu2 %v189_v17  ;;  %155 = vmatpush.msra.mxu0 %v142_v18  ;;  %v199_v37 = vld [vmem:[#allocation5 + $0x118] sm:$0xff]  ;;  %v198_v40 = vld [vmem:[#allocation5 + $0x110] sm:$0xff]  ;;  %v134_v43 = vld [vmem:[#allocation5 + $0x8] sm:$0xff] }
  0x1c   :  { %218 = vmatpush.msra.mxu1 %v205_v19  ;;  %v182_v38 = vld [vmem:[#allocation5 + $0x98] sm:$0xff]  ;;  %v181_v41 = vld [vmem:[#allocation5 + $0x90] sm:$0xff]  ;;  %v197_v44 = vld [vmem:[#allocation5 + $0x108] sm:$0xff] }
  0x1d   :  { %305 = vmatpush.msra.mxu2 %v188_v20  ;;  %156 = vmatpush.msra.mxu0 %v141_v21  ;;  %v359_v42 = vld [vmem:[#allocation7 + $0x78] sm:$0xff]  ;;  %v358_v45 = vld [vmem:[#allocation7 + $0x70] sm:$0xff]  ;;  %v180_v46 = vld [vmem:[#allocation5 + $0x88] sm:$0xff] }
  0x1e   :  { %219 = vmatpush.msra.mxu1 %v204_v22  ;;  %360 = vmatpush.msra.mxu3 %v359_v42  ;;  %v357_v47 = vld [vmem:[#allocation7 + $0x68] sm:$0xff]  ;;  %v133_v48 = vld [vmem:[#allocation5] sm:$0xff]  ;;  %v422_v52 = vld [vmem:[#allocation7 + $0x178] sm:$0xff] }
  0x1f   :  { %306 = vmatpush.msra.mxu2 %v187_v23  ;;  %157 = vmatpush.msra.mxu0 %v140_v24  ;;  %v196_v49 = vld [vmem:[#allocation5 + $0x100] sm:$0xff]  ;;  %v763_v53 = vld [vmem:[#allocation7 + $0xf8] sm:$0xff]  ;;  %v421_v55 = vld [vmem:[#allocation7 + $0x170] sm:$0xff] }
  0x20   :  { %220 = vmatpush.msra.mxu1 %v203_v25  ;;  %361 = vmatpush.msra.mxu3 %v358_v45  ;;  %v179_v50 = vld [vmem:[#allocation5 + $0x80] sm:$0xff]  ;;  %v768_v56 = vld [vmem:[#allocation7 + $0xf0] sm:$0xff]  ;;  %v355_v57 = vld [vmem:[#allocation7 + $0x58] sm:$0xff] }
  0x21   :  { %307 = vmatpush.msra.mxu2 %v186_v26  ;;  %158 = vmatpush.msra.mxu0 %v139_v27  ;;  %v761_v51 = vld [vmem:[#allocation2] sm:$0xff]  ;;  %v420_v58 = vld [vmem:[#allocation7 + $0x168] sm:$0xff]  ;;  %v354_v60 = vld [vmem:[#allocation7 + $0x50] sm:$0xff] }
  0x22   :  { %221 = vmatpush.msra.mxu1 %v202_v28  ;;  %362 = vmatpush.msra.mxu3 %v357_v47  ;;  %v356_v54 = vld [vmem:[#allocation7 + $0x60] sm:$0xff]  ;;  %v771_v59 = vld [vmem:[#allocation7 + $0xe8] sm:$0xff]  ;;  %v779_v0 = vld [vmem:[#allocation7 + $0xd8] sm:$0xff] }
  0x23   :  { %308 = vmatpush.msra.mxu2 %v185_v29  ;;  %159 = vmatpush.msra.mxu0 %v138_v30  ;;  %v774_v61 = vld [vmem:[#allocation2 + $0x8] sm:$0xff]  ;;  %v776_v62 = vld [vmem:[#allocation7 + $0xe0] sm:$0xff]  ;;  %v418_v2 = vld [vmem:[#allocation7 + $0x158] sm:$0xff] }
  0x24   :  { %222 = vmatpush.msra.mxu1 %v201_v31  ;;  %363 = vmatpush.msra.mxu3 %v356_v54  ;;  %v419_v63 = vld [vmem:[#allocation7 + $0x160] sm:$0xff]  ;;  %v353_v1 = vld [vmem:[#allocation7 + $0x48] sm:$0xff]  ;;  %v785_v3 = vld [vmem:[#allocation7 + $0xd0] sm:$0xff] }
  0x25   :  { %309 = vmatpush.msra.mxu2 %v184_v32  ;;  %160 = vmatpush.msra.mxu0 %v137_v33  ;;  %v417_v4 = vld [vmem:[#allocation7 + $0x150] sm:$0xff]  ;;  %v788_v5 = vld [vmem:[#allocation7 + $0xc8] sm:$0xff]  ;;  %v797_v8 = vld [vmem:[#allocation2 + $0x18] sm:$0xff] }
  0x26   :  { %223 = vmatpush.msra.mxu1 %v200_v34  ;;  %364 = vmatpush.msra.mxu3 %v355_v57  ;;  %v791_v6 = vld [vmem:[#allocation2 + $0x10] sm:$0xff]  ;;  %v416_v7 = vld [vmem:[#allocation7 + $0x148] sm:$0xff]  ;;  %v352_v9 = vld [vmem:[#allocation7 + $0x40] sm:$0xff] }
  0x27   :  { %310 = vmatpush.msra.mxu2 %v183_v35  ;;  %161 = vmatpush.msra.mxu0 %v136_v36  ;;  %v415_v10 = vld [vmem:[#allocation7 + $0x140] sm:$0xff]  ;;  %v351_v12 = vld [vmem:[#allocation7 + $0x38] sm:$0xff]  ;;  %v350_v15 = vld [vmem:[#allocation7 + $0x30] sm:$0xff]  ;;  %v72_v36 = vlaneseq }
  0x28   :  { %224 = vmatpush.msra.mxu1 %v199_v37  ;;  %365 = vmatpush.msra.mxu3 %v354_v60  ;;  %v802_v11 = vld [vmem:[#allocation7 + $0xc0] sm:$0xff]  ;;  %v414_v13 = vld [vmem:[#allocation7 + $0x138] sm:$0xff]  ;;  %v413_v16 = vld [vmem:[#allocation7 + $0x130] sm:$0xff] }
  0x29   :  { %311 = vmatpush.msra.mxu2 %v182_v38  ;;  %162 = vmatpush.msra.mxu0 %v135_v39  ;;  %v805_v14 = vld [vmem:[#allocation7 + $0xb8] sm:$0xff]  ;;  %v807_v17 = vld [vmem:[#allocation7 + $0xb0] sm:$0xff]  ;;  %v349_v18 = vld [vmem:[#allocation7 + $0x28] sm:$0xff]  ;;  %v73_v37 = vshrl.u32 %v72_v36, 7 }
  0x2a   :  { %225 = vmatpush.msra.mxu1 %v198_v40  ;;  %366 = vmatpush.msra.mxu3 %v353_v1  ;;  %v412_v19 = vld [vmem:[#allocation7 + $0x128] sm:$0xff]  ;;  %v348_v21 = vld [vmem:[#allocation7 + $0x20] sm:$0xff]  ;;  %v347_v24 = vld [vmem:[#allocation7 + $0x18] sm:$0xff] }
  0x2b   :  { %312 = vmatpush.msra.mxu2 %v181_v41  ;;  %163 = vmatpush.msra.mxu0 %v134_v43  ;;  %v395_v20 = vld [vmem:[#allocation7 + $0xa8] sm:$0xff]  ;;  %v411_v22 = vld [vmem:[#allocation7 + $0x120] sm:$0xff]  ;;  %v410_v25 = vld [vmem:[#allocation7 + $0x118] sm:$0xff]  ;;  %v81_v38 = vand.u32 15, %v73_v37  ;;  %v75_v60 = vadd.s32 16, %v73_v37 }
  0x2c   :  { %226 = vmatpush.msra.mxu1 %v197_v44  ;;  %367 = vmatpush.msra.mxu3 %v352_v9  ;;  %v394_v23 = vld [vmem:[#allocation7 + $0xa0] sm:$0xff]  ;;  %v393_v26 = vld [vmem:[#allocation7 + $0x98] sm:$0xff]  ;;  %v346_v27 = vld [vmem:[#allocation7 + $0x10] sm:$0xff] }
  0x2d   :  { %313 = vmatpush.msra.mxu2 %v180_v46  ;;  %164 = vmatpush.msra.mxu0 %v133_v48  ;;  %v409_v28 = vld [vmem:[#allocation7 + $0x110] sm:$0xff]  ;;  %v345_v30 = vld [vmem:[#allocation7 + $0x8] sm:$0xff]  ;;  %v344_v33 = vld [vmem:[#allocation7] sm:$0xff]  ;;  %vm820_vm1 = vcmp.eq.s32.totalorder %v81_v38, 0 }
  0x2e   :  { %227 = vmatpush.msra.mxu1 %v196_v49  ;;  %165 = vmatmul.f32.vlgmr.msra.gmra.mxu0 %v761_v51  ;;  %v392_v29 = vld [vmem:[#allocation7 + $0x90] sm:$0xff]  ;;  %v408_v31 = vld [vmem:[#allocation7 + $0x108] sm:$0xff]  ;;  %v407_v34 = vld [vmem:[#allocation7 + $0x100] sm:$0xff] }
  0x2f   :  { %314 = vmatpush.msra.mxu2 %v179_v50  ;;  %228 = vmatmul.f32.vlgmr.msra.gmra.mxu1 %v761_v51  ;;  %v391_v32 = vld [vmem:[#allocation7 + $0x88] sm:$0xff]  ;;  %v390_v35 = vld [vmem:[#allocation7 + $0x80] sm:$0xff] }
  0x30   :  { %315 = vmatmul.f32.vlgmr.msra.gmra.mxu2 %v761_v51  ;;  %423 = vmatpush.msrb.mxu0 %v422_v52 }
  0x31   :  { %492 = vmatpush.msrb.mxu1 %v763_v53  ;;  %565 = vmatpush.msrb.mxu2 %v422_v52  ;;  %v74_v52 = vadd.s32 8, %v73_v37 }
  0x32   :  { %424 = vmatpush.msrb.mxu0 %v421_v55  ;;  %368 = vmatpush.msra.mxu3 %v351_v12 }
  0x33   :  { %493 = vmatpush.msrb.mxu1 %v768_v56  ;;  %566 = vmatpush.msrb.mxu2 %v421_v55 }
  0x34   :  { %425 = vmatpush.msrb.mxu0 %v420_v58  ;;  %369 = vmatpush.msra.mxu3 %v350_v15 }
  0x35   :  { %494 = vmatpush.msrb.mxu1 %v771_v59  ;;  %567 = vmatpush.msrb.mxu2 %v420_v58 }
  0x36   :  { %168 = vmatmul.f32.gmra.mxu0 %v774_v61  ;;  %370 = vmatpush.msra.mxu3 %v349_v18 }
  0x37   :  { %495 = vmatpush.msrb.mxu1 %v776_v62  ;;  %426 = vmatpush.msrb.mxu0 %v419_v63 }
  0x38   :  { %231 = vmatmul.f32.gmra.mxu1 %v774_v61  ;;  %318 = vmatmul.f32.gmra.mxu2 %v774_v61 }
  0x39   :  { %496 = vmatpush.msrb.mxu1 %v779_v0  ;;  %568 = vmatpush.msrb.mxu2 %v419_v63 }
  0x3a   :  { %427 = vmatpush.msrb.mxu0 %v418_v2  ;;  %371 = vmatpush.msra.mxu3 %v348_v21 }
  0x3b   :  { %497 = vmatpush.msrb.mxu1 %v785_v3  ;;  %569 = vmatpush.msrb.mxu2 %v418_v2 }
  0x3c   :  { %428 = vmatpush.msrb.mxu0 %v417_v4  ;;  %372 = vmatpush.msra.mxu3 %v347_v24 }
  0x3d   :  { %498 = vmatpush.msrb.mxu1 %v788_v5  ;;  %570 = vmatpush.msrb.mxu2 %v417_v4 }
  0x3e   :  { %171 = vmatmul.f32.gmra.mxu0 %v791_v6  ;;  %373 = vmatpush.msra.mxu3 %v346_v27 }
  0x3f   :  { %429 = vmatpush.msrb.mxu0 %v416_v7  ;;  %571 = vmatpush.msrb.mxu2 %v416_v7 }
  0x40   :  { %234 = vmatmul.f32.gmra.mxu1 %v791_v6  ;;  %321 = vmatmul.f32.gmra.mxu2 %v791_v6 }
  0x41   :  { %430 = vmatpush.msrb.mxu0 %v415_v10  ;;  %499 = vmatpush.msrb.mxu1 %v802_v11 }
  0x42   :  { %572 = vmatpush.msrb.mxu2 %v415_v10  ;;  %374 = vmatpush.msra.mxu3 %v345_v30 }
  0x43   :  { %431 = vmatpush.msrb.mxu0 %v414_v13  ;;  %500 = vmatpush.msrb.mxu1 %v805_v14 }
  0x44   :  { %573 = vmatpush.msrb.mxu2 %v414_v13  ;;  %375 = vmatpush.msra.mxu3 %v344_v33 }
  0x45   :  { %432 = vmatpush.msrb.mxu0 %v413_v16  ;;  %501 = vmatpush.msrb.mxu1 %v807_v17 }
  0x46   :  { %174 = vmatmul.f32.gmra.mxu0 %v797_v8  ;;  %574 = vmatpush.msrb.mxu2 %v413_v16 }
  0x47   :  { %433 = vmatpush.msrb.mxu0 %v412_v19  ;;  %502 = vmatpush.msrb.mxu1 %v395_v20 }
  0x48   :  { %237 = vmatmul.f32.gmra.mxu1 %v797_v8  ;;  %324 = vmatmul.f32.gmra.mxu2 %v797_v8 }
  0x49   :  { %575 = vmatpush.msrb.mxu2 %v412_v19  ;;  %434 = vmatpush.msrb.mxu0 %v411_v22 }
  0x4a   :  { %503 = vmatpush.msrb.mxu1 %v394_v23  ;;  %581 = vmatpush.msrb.mxu3 %v763_v53  ;;  %v603_v53 = vld [vmem:[%s887_s2] ss:$0 sm:$0xff] }
  0x4b   :  { %576 = vmatpush.msrb.mxu2 %v411_v22  ;;  %435 = vmatpush.msrb.mxu0 %v410_v25 }
  0x4c   :  { %504 = vmatpush.msrb.mxu1 %v393_v26  ;;  %582 = vmatpush.msrb.mxu3 %v768_v56  ;;  %v88_v56 = vand.u32 15, %v74_v52 }
  0x4d   :  { %577 = vmatpush.msrb.mxu2 %v410_v25  ;;  %436 = vmatpush.msrb.mxu0 %v409_v28 }
  0x4e   :  { %505 = vmatpush.msrb.mxu1 %v392_v29  ;;  %583 = vmatpush.msrb.mxu3 %v771_v59  ;;  %vm832_vm3 = vcmp.eq.s32.totalorder %v88_v56, 15 }
  0x4f   :  { %578 = vmatpush.msrb.mxu2 %v409_v28  ;;  %437 = vmatpush.msrb.mxu0 %v408_v31 }
  0x50   :  { %506 = vmatpush.msrb.mxu1 %v391_v32  ;;  %584 = vmatpush.msrb.mxu3 %v776_v62 }
  0x51   :  { %579 = vmatpush.msrb.mxu2 %v408_v31  ;;  %438 = vmatpush.msrb.mxu0 %v407_v34 }
  0x52   :  { %507 = vmatpush.msrb.mxu1 %v390_v35  ;;  %585 = vmatpush.msrb.mxu3 %v779_v0 }
  0x53   :  { %580 = vmatpush.msrb.mxu2 %v407_v34 }
  0x54   :  { %586 = vmatpush.msrb.mxu3 %v785_v3 }
  0x56   :  { %587 = vmatpush.msrb.mxu3 %v788_v5  ;;  %v95_v5 = vand.u32 15, %v75_v60 }
  0x58   :  { %588 = vmatpush.msrb.mxu3 %v802_v11  ;;  %v76_v11 = vadd.s32 24, %v73_v37  ;;  %vm840_vm4 = vcmp.eq.s32.totalorder %v95_v5, 0 }
  0x5a   :  { %589 = vmatpush.msrb.mxu3 %v805_v14 }
  0x5c   :  { %590 = vmatpush.msrb.mxu3 %v807_v17 }
  0x5e   :  { %591 = vmatpush.msrb.mxu3 %v395_v20  ;;  %v102_v20 = vand.u32 15, %v76_v11 }
  0x60   :  { %592 = vmatpush.msrb.mxu3 %v394_v23  ;;  %vm848_vm5 = vcmp.eq.s32.totalorder %v102_v20, 15 }
  0x62   :  { %593 = vmatpush.msrb.mxu3 %v393_v26 }
  0x64   :  { %594 = vmatpush.msrb.mxu3 %v392_v29 }
  0x66   :  { %595 = vmatpush.msrb.mxu3 %v391_v32 }
  0x68   :  { %596 = vmatpush.msrb.mxu3 %v390_v35 }
  0xab   :  { %v166_v39 = vpop.f32.mrf.mxu0 }
  0xac   :  { %v246_v40 = vrot.slane %v166_v39, 7  ;;  %v229_v41 = vpop.f32.mrf.mxu1 }
  0xad   :  { %v275_v49 = vrot.slane %v229_v41, 1 }
  0xae   :  { %v257_v42 = vsel %vm245_vm0, %v166_v39, %v246_v40 }
  0xaf   :  { %v266_v44 = vsel %vm820_vm1, 0.0, %v257_v42 }
  0xb3   :  { %v316_v45 = vpop.f32.mrf.mxu2  ;;  %v169_v46 = vpop.f32.mrf.mxu0 }
  0xb4   :  { %v317_v47 = vadd.f32 %v316_v45, %v266_v44  ;;  %v247_v57 = vrot.slane %v169_v46, 7 }
  0xb5   :  { %v232_v48 = vpop.f32.mrf.mxu1 }
  0xb6   :  { %v276_v50 = vrot.slane %v232_v48, 1  ;;  %v248_v3 = vsel %vm245_vm0, %v246_v40, %v247_v57 }
  0xb8   :  { %v277_v54 = vsel %vm274_vm2, %v275_v49, %v276_v50  ;;  %v604_v49 = vld [vmem:[%s889_s4] ss:$0 sm:$0xff]  ;;  %s712_s4 = smov [#allocation8]  }
  0xb9   :  { %v328_v55 = vadd.f32 %v317_v47, %v277_v54  ;;  %s549_s10 = sshll.u32 %s712_s4, 4  ;;  %s550_s10 = int_to_ptr.vmem [resolvable:$true] %s549_s10 }
  0xbb   :  { %v319_v58 = vpop.f32.mrf.mxu2  ;;  %v336_v59 = vadd.f32 %v603_v53, %v328_v55  ;;  %v172_v62 = vpop.f32.mrf.mxu0 }
  0xbc   :  { %v249_v4 = vrot.slane %v172_v62, 7  ;;  %v320_v7 = vadd.f32 %v319_v58, %v248_v3 }
  0xbd   :  { %v235_v63 = vpop.f32.mrf.mxu1  ;;  %v340_v0 = vmax.f32 %v336_v59, 0.0 }
  0xbe   :  { %v278_v2 = vrot.slane %v235_v63, 1  ;;  %v250_v14 = vsel %vm245_vm0, %v247_v57, %v249_v4 }
  0xbf   :  { %376 = vmatmul.f32.vlgmr.msra.gmra.mxu3 %v340_v0  ;;  %439 = vmatmul.f32.vlgmr.msrb.gmra.mxu0 %v340_v0  ;;  %v268_v19 = vsel %vm840_vm4, 0.0, %v250_v14 }
  0xc0   :  { %v279_v9 = vsel %vm274_vm2, %v276_v50, %v278_v2  ;;  %508 = vmatmul.f32.vlgmr.msrb.gmra.mxu1 %v340_v0 }
  0xc1   :  { %v296_v10 = vsel %vm832_vm3, 0.0, %v279_v9 }
  0xc2   :  { %v329_v12 = vadd.f32 %v320_v7, %v296_v10 }
  0xc3   :  { %v322_v15 = vpop.f32.mrf.mxu2  ;;  %v175_v16 = vpop.f32.mrf.mxu0 }
  0xc4   :  { %v337_v17 = vadd.f32 %v603_v53, %v329_v12  ;;  %v323_v23 = vadd.f32 %v322_v15, %v268_v19  ;;  %v251_v24 = vrot.slane %v175_v16, 7 }
  0xc5   :  { %v238_v18 = vpop.f32.mrf.mxu1 }
  0xc6   :  { %v280_v21 = vrot.slane %v238_v18, 1  ;;  %v341_v22 = vmax.f32 %v337_v17, 0.0  ;;  %v252_v29 = vsel %vm245_vm0, %v249_v4, %v251_v24 }
  0xc8   :  { %v281_v25 = vsel %vm274_vm2, %v278_v2, %v280_v21  ;;  %379 = vmatmul.f32.gmra.mxu3 %v341_v22  ;;  %442 = vmatmul.f32.gmra.mxu0 %v341_v22  ;;  %v286_v28 = vsel %vm274_vm2, %v280_v21, %v238_v18 }
  0xc9   :  { %511 = vmatmul.f32.gmra.mxu1 %v341_v22  ;;  %v330_v26 = vadd.f32 %v323_v23, %v281_v25  ;;  %v298_v33 = vsel %vm848_vm5, 0.0, %v286_v28 }
  0xcb   :  { %v325_v30 = vpop.f32.mrf.mxu2  ;;  %v338_v31 = vadd.f32 %v603_v53, %v330_v26 }
  0xcc   :  { %v326_v32 = vadd.f32 %v325_v30, %v252_v29 }
  0xcd   :  { %v342_v34 = vmax.f32 %v338_v31, 0.0 }
  0xce   :  { %v331_v35 = vadd.f32 %v326_v32, %v298_v33 }
  0xcf   :  { %445 = vmatmul.f32.vlgmr.msrb.gmra.mxu2 %v342_v34 }
  0xd0   :  { %382 = vmatmul.f32.gmra.mxu3 %v342_v34  ;;  %v339_v36 = vadd.f32 %v603_v53, %v331_v35 }
  0xd2   :  { %v343_v37 = vmax.f32 %v339_v36, 0.0 }
  0xd7   :  { %448 = vmatmul.f32.gmra.mxu2 %v343_v37 }
  0xd8   :  { %385 = vmatmul.f32.gmra.mxu3 %v343_v37 }
  0xe0   :  { %514 = vmatmul.f32.vlgmr.msrb.gmra.mxu3 %v342_v34 }
  0xe8   :  { %517 = vmatmul.f32.gmra.mxu3 %v343_v37 }
 0x13c   :  { %v440_v38 = vpop.f32.mrf.mxu0 }
 0x13d   :  { %v476_v44 = vrot.slane %v440_v38, 1  ;;  %v509_v45 = vpop.f32.mrf.mxu1 }
 0x142   :  { %v377_v39 = vpop.f32.mrf.mxu3 }
 0x143   :  { %v456_v40 = vrot.slane %v377_v39, 7 }
 0x145   :  { %v467_v41 = vsel %vm245_vm0, %v377_v39, %v456_v40  ;;  %v443_v42 = vpop.f32.mrf.mxu0 }
 0x146   :  { %v468_v46 = vsel %vm820_vm1, 0.0, %v467_v41  ;;  %v477_v47 = vrot.slane %v443_v42, 1  ;;  %v512_v62 = vpop.f32.mrf.mxu1 }
 0x147   :  { %v510_v48 = vadd.f32 %v509_v45, %v468_v46 }
 0x148   :  { %v478_v50 = vsel %vm274_vm2, %v476_v44, %v477_v47 }
 0x149   :  { %v521_v52 = vadd.f32 %v510_v48, %v478_v50 }
 0x14b   :  { %v529_v53 = vadd.f32 %v604_v49, %v521_v52  ;;  %v380_v54 = vpop.f32.mrf.mxu3 }
 0x14c   :  { %v457_v56 = vrot.slane %v380_v54, 7 }
 0x14d   :  { %v533_v55 = vadd.f32 %v529_v53, %v761_v51 }
 0x14e   :  { %v458_v58 = vsel %vm245_vm0, %v456_v40, %v457_v56 }
 0x14f   :  { %v537_v57 = vmax.f32 %v533_v55, 0.0  ;;  %v513_v63 = vadd.f32 %v512_v62, %v458_v58 }
 0x151   :  { %541 = vst [vmem:[#allocation8] sm:$0xff] %v537_v57 }
 0x152   :  { %v446_v43 = vpop.f32.mrf.mxu2 }
 0x153   :  { %v479_v59 = vrot.slane %v446_v43, 1  ;;  %v383_v60 = vpop.f32.mrf.mxu3 }
 0x154   :  { %v459_v7 = vrot.slane %v383_v60, 7 }
 0x155   :  { %v480_v0 = vsel %vm274_vm2, %v477_v47, %v479_v59 }
 0x156   :  { %v489_v2 = vsel %vm832_vm3, 0.0, %v480_v0  ;;  %v460_v11 = vsel %vm245_vm0, %v457_v56, %v459_v7 }
 0x157   :  { %v522_v3 = vadd.f32 %v513_v63, %v489_v2  ;;  %v470_v14 = vsel %vm840_vm4, 0.0, %v460_v11 }
 0x159   :  { %v530_v4 = vadd.f32 %v604_v49, %v522_v3 }
 0x15a   :  { %v449_v10 = vpop.f32.mrf.mxu2 }
 0x15b   :  { %v534_v5 = vadd.f32 %v530_v4, %v774_v61  ;;  %v386_v51 = vpop.f32.mrf.mxu3  ;;  %v481_v12 = vrot.slane %v449_v10, 1 }
 0x15c   :  { %v461_v18 = vrot.slane %v386_v51, 7 }
 0x15d   :  { %v538_v9 = vmax.f32 %v534_v5, 0.0  ;;  %v482_v1 = vsel %vm274_vm2, %v479_v59, %v481_v12  ;;  %v487_v61 = vsel %vm274_vm2, %v481_v12, %v449_v10 }
 0x15e   :  { %v462_v21 = vsel %vm245_vm0, %v459_v7, %v461_v18  ;;  %v491_v13 = vsel %vm848_vm5, 0.0, %v487_v61 }
 0x15f   :  { %542 = vst [vmem:[#allocation8 + $0x8] sm:$0xff] %v538_v9 }
 0x163   :  { %v515_v15 = vpop.f32.mrf.mxu3 }
 0x164   :  { %v516_v16 = vadd.f32 %v515_v15, %v470_v14 }
 0x166   :  { %v523_v17 = vadd.f32 %v516_v16, %v482_v1 }
 0x168   :  { %v531_v19 = vadd.f32 %v604_v49, %v523_v17 }
 0x16a   :  { %v535_v20 = vadd.f32 %v531_v19, %v791_v6 }
 0x16b   :  { %v518_v22 = vpop.f32.mrf.mxu3 }
 0x16c   :  { %v539_v23 = vmax.f32 %v535_v20, 0.0  ;;  %v519_v24 = vadd.f32 %v518_v22, %v462_v21 }
 0x16e   :  { %543 = vst [vmem:[#allocation8 + $0x10] sm:$0xff] %v539_v23  ;;  %v524_v25 = vadd.f32 %v519_v24, %v491_v13 }
 0x170   :  { %v532_v26 = vadd.f32 %v604_v49, %v524_v25 }
 0x172   :  { %v536_v28 = vadd.f32 %v532_v26, %v797_v8 }
 0x174   :  { %v540_v6 = vmax.f32 %v536_v28, 0.0 }
 0x176   :  { %544 = vst [vmem:[#allocation8 + $0x18] sm:$0xff] %v540_v6 }
 0x177   :  { %557 = dma.vmem_to_hbm [thread:$0]  %s550_s10, 512, %s552_s13, [#allocation4], %s708_s26, %s708_s26, %s709_s27  }
 0x178   :  { %705 = dma.done.wait [#allocation4], 512  }
 0x179   :  { %706 = vsyncadd [#allocation4], 4294966784 }
 0x17a   :  { %562 = vsyncpa [#allocation3], 1 }
 0x17b   :  { %563 = vsyncpa [#allocation6], 1 }
 0x17c   :  { %564 = vsyncpa [#allocation4], 1 }

</bundles_post_ra>
